<compile_context>
chip_gen: v7x
topology: tpu7x:2x2x1
jax: 0.10.0
libtpu: 0.0.40
codegen_flags: <defaults>
</compile_context>

<pallas_src>
import functools

import jax
import jax.numpy as jnp
from jax.experimental import pallas as pl
from jax.experimental.pallas import tpu as pltpu


def _tv_kernel(mask_ref, x_ref, o_ref, *, method: str, H: int, W: int,
               eps: float, scale: float, nc_valid: int, tb: int,
               mask_pad_rows: bool):
    HW = H * W

    x_raw = x_ref[...]                               # (TB, HW), input dtype
    xf = x_raw.astype(jnp.float32)
    # pltpu.roll matches jnp.roll but only allows non-negative shifts:
    # roll by (HW - s) gives the forward neighbour x[k + s] (wrap is masked).
    # Roll in the raw input dtype; cast afterwards.
    x_h = pltpu.roll(x_raw, HW - W, axis=1).astype(jnp.float32)   # x[k + W]
    x_w = pltpu.roll(x_raw, HW - 1, axis=1).astype(jnp.float32)   # x[k + 1]

    # Flattened index k = row*W + col. dh valid for k < (H-1)*W, dw valid for
    # col != W-1; invalid positions are exactly where the reference's
    # replicated-edge diff is zero.
    dh = (x_h - xf) * mask_ref[0:1, :]
    dw = (x_w - xf) * mask_ref[1:2, :]

    if method == "ani":
        combined = jnp.abs(dh) + jnp.abs(dw)         # 0.5 folded into `scale`
    elif method in ("iso", "sos"):
        combined = dh * dh + dw * dw                 # real(d * conj(d)), real d
        if method == "iso":
            combined = jnp.sqrt(combined * 0.5 + eps)
    else:
        raise ValueError(f"method can only be ani, iso, or sos, but was {method}")

    if mask_pad_rows:
        # Zero contributions from zero-padded (n, c) slices (only needed for
        # 'iso', where sqrt(eps) would otherwise leak into the sum).
        rows = jax.lax.broadcasted_iota(jnp.int32, (tb, 1), 0) + pl.program_id(0) * tb
        combined = combined * (rows < nc_valid).astype(jnp.float32)

    # Per-step reduction: block -> scalar (f32), stored into this step's own
    # lane-dense (8, 128) output block; wrapper sums the NB partials.
    partial = jnp.sum(combined) * scale
    o_ref[...] = jnp.full(o_ref.shape, partial, jnp.float32)


def _choose_block_rows(nc: int, hw: int, itemsize: int,
                       budget_bytes: int = 4 << 20) -> int:
    """# of (n, c) slices per block: ~4 MiB, legal sublane dim."""
    if nc <= 8:
        return nc                           # block dim == full array dim: legal
    tb_max = max(8, (budget_bytes // (itemsize * hw)) // 8 * 8)
    if nc <= tb_max:
        return nc                           # block dim == full array dim: legal
    for tb in range(tb_max, 7, -8):         # largest multiple-of-8 divisor of nc
        if nc % tb == 0:
            return tb
    return tb_max                           # no divisor: NC gets zero-padded


def tv_loss(x: jax.Array, method: str) -> jax.Array:
    """Total variation loss over the spatial dims (2, 3) of an NCHW tensor."""
    if method not in ("ani", "iso", "sos"):
        raise ValueError(f"method can only be ani, iso, or sos, but was {method}")
    N, C, H, W = x.shape
    NC, HW = N * C, H * W
    total = N * C * H * W

    xr = x.reshape(NC, HW)                  # contiguous reshape: no data movement
    TB = _choose_block_rows(NC, HW, x.dtype.itemsize)
    NB = -(-NC // TB)                       # cdiv
    NC_pad = NB * TB
    if NC_pad != NC:                        # rare fallback path
        xr = jnp.pad(xr, ((0, NC_pad - NC), (0, 0)))

    # Boundary masks (built once on the host side of the trace, fetched once).
    k = jnp.arange(HW, dtype=jnp.int32)
    mh = (k < (H - 1) * W).astype(jnp.float32)     # valid rows for x[k+W]-x[k]
    mw = (k % W != W - 1).astype(jnp.float32)      # valid cols for x[k+1]-x[k]
    masks = jnp.stack([mh, mw], axis=0)            # (2, HW)

    eps = float(jnp.finfo(x.dtype).eps) if method == "iso" else 0.0
    scale = (1.0 if method == "iso" else 0.5) / float(total)

    kernel = functools.partial(
        _tv_kernel, method=method, H=H, W=W, eps=eps, scale=scale,
        nc_valid=NC, tb=TB, mask_pad_rows=(NC_pad != NC and method == "iso"))

    # VMEM accounting: double-buffered input, two roll temporaries (input
    # dtype), ~two f32 elementwise temporaries, double-buffered masks, slack.
    block_bytes = TB * HW * x.dtype.itemsize
    est_vmem = (2 * block_bytes            # input (double-buffered)
                + 2 * block_bytes          # x_h, x_w roll temporaries
                + 2 * TB * HW * 4          # f32 intermediates
                + 2 * 2 * HW * 4           # masks (double-buffered)
                + (1 << 16))
    compiler_kwargs = {}
    if est_vmem > (12 << 20):
        # Cap at 40 MiB: safe on v7x (64 MiB physical), covers v5e's 16 MiB
        # default scoped limit.
        compiler_kwargs["vmem_limit_bytes"] = int(
            min(est_vmem + (est_vmem >> 2), 40 << 20))

    out = pl.pallas_call(
        kernel,
        out_shape=jax.ShapeDtypeStruct((NB, 8, 128), jnp.float32),
        grid_spec=pltpu.PrefetchScalarGridSpec(
            num_scalar_prefetch=0,
            grid=(NB,),
            in_specs=[
                pl.BlockSpec((2, HW), lambda i: (0, 0)),     # masks (constant)
                pl.BlockSpec((TB, HW), lambda i: (i, 0)),    # input slab
            ],
            out_specs=pl.BlockSpec((1, 8, 128), lambda i: (i, 0, 0)),
        ),
        compiler_params=pltpu.CompilerParams(
            dimension_semantics=("parallel",),   # no carried state: megacore OK
            **compiler_kwargs,
        ),
    )(masks, xr)

    return jnp.sum(out[:, 0, 0]).astype(x.dtype)


def tv_loss_ref(x: jax.Array, method: str) -> jax.Array:
    """Pure-JAX transliteration of the PyTorch reference (dims = [2, 3])."""
    dims = list(range(2, x.ndim))
    diffs = []
    for dim in dims:
        xt = jnp.moveaxis(x, dim, 0)
        xt = jnp.concatenate([xt, xt[-1:]], axis=0)
        d = xt[1:] - xt[:-1]
        if method == "ani":
            d = jnp.abs(d)
        else:
            d = d * d
        diffs.append(jnp.moveaxis(d, 0, dim))
    m = jnp.mean(jnp.stack(diffs), axis=0)
    if method == "iso":
        m = jnp.sqrt(m + jnp.finfo(m.dtype).eps)
    return jnp.mean(m)


if __name__ == "__main__":
    key = jax.random.PRNGKey(0)
    x = jax.random.normal(key, (2, 4, 16, 16), dtype=jnp.float32)

    for method in ("ani", "iso", "sos"):
        got = jax.block_until_ready(tv_loss(x, method))
        want = jax.block_until_ready(tv_loss_ref(x, method))
        assert jnp.allclose(got, want, rtol=1e-5, atol=1e-6), (
            f"{method}: kernel={got} ref={want}"
        )

    print("KERNEL_OK")
</pallas_src>

<mosaic_0001>
module attributes {stable_mosaic.version = 11 : i64} {
  func.func @_tv_kernel(%arg0: i32, %arg1: memref<2x256xf32, #tpu.memory_space<vmem>>, %arg2: memref<8x256xf32, #tpu.memory_space<vmem>>, %arg3: memref<1x8x128xf32, #tpu.memory_space<vmem>>) attributes {dimension_semantics = [#tpu.dimension_semantics<parallel>], iteration_bounds = array<i64: 1>, scalar_prefetch = 0 : i64, scratch_operands = 0 : i64, tpu.core_type = #tpu.core_type<tc>, window_params = [{pipeline_mode = #tpu.pipeline_mode<synchronous>, transform_indices = @transform_0, window_bounds = array<i64: 2, 256>}, {transform_indices = @transform_1, window_bounds = array<i64: 8, 256>}, {transform_indices = @transform_2, window_bounds = array<i64: 1, 8, 128>}]} {
    %c0 = arith.constant 0 : index
    %c0_0 = arith.constant 0 : index
    %0 = vector.load %arg2[%c0, %c0_0] : memref<8x256xf32, #tpu.memory_space<vmem>>, vector<8x256xf32>
    %c240_i32 = arith.constant 240 : i32
    %1 = tpu.dynamic_rotate %0 by %c240_i32 dim 1 : vector<8x256xf32>, i32 -> vector<8x256xf32>
    %c255_i32 = arith.constant 255 : i32
    %2 = tpu.dynamic_rotate %0 by %c255_i32 dim 1 : vector<8x256xf32>, i32 -> vector<8x256xf32>
    %3 = arith.subf %1, %0 : vector<8x256xf32>
    %c0_1 = arith.constant 0 : index
    %c0_2 = arith.constant 0 : index
    %4 = vector.load %arg1[%c0_1, %c0_2] : memref<2x256xf32, #tpu.memory_space<vmem>>, vector<1x256xf32>
    %5 = vector.broadcast %4 : vector<1x256xf32> to vector<8x256xf32>
    %6 = arith.mulf %3, %5 : vector<8x256xf32>
    %7 = arith.subf %2, %0 : vector<8x256xf32>
    %c1 = arith.constant 1 : index
    %c0_3 = arith.constant 0 : index
    %8 = vector.load %arg1[%c1, %c0_3] : memref<2x256xf32, #tpu.memory_space<vmem>>, vector<1x256xf32>
    %9 = vector.broadcast %8 : vector<1x256xf32> to vector<8x256xf32>
    %10 = arith.mulf %7, %9 : vector<8x256xf32>
    %11 = math.absf %6 : vector<8x256xf32>
    %12 = math.absf %10 : vector<8x256xf32>
    %13 = arith.addf %11, %12 : vector<8x256xf32>
    %14 = vector.shape_cast %13 : vector<8x256xf32> to vector<1x8x256xf32>
    %cst = arith.constant dense<0.000000e+00> : vector<1xf32>
    %15 = vector.multi_reduction <add>, %14, %cst [1, 2] : vector<1x8x256xf32> to vector<1xf32>
    %16 = vector.shape_cast %15 : vector<1xf32> to vector<1x1x1xf32>
    %17 = vector.extract %16[0, 0, 0] : f32 from vector<1x1x1xf32>
    %cst_4 = arith.constant 2.44140625E-4 : f32
    %18 = arith.mulf %17, %cst_4 : f32
    %19 = vector.broadcast %18 : f32 to vector<1x8x128xf32>
    %c0_5 = arith.constant 0 : index
    %c0_6 = arith.constant 0 : index
    %c0_7 = arith.constant 0 : index
    %20 = vector.load %arg3[%c0_5, %c0_6, %c0_7] : memref<1x8x128xf32, #tpu.memory_space<vmem>>, vector<1x8x128xf32>
    tpu.vector_store %arg3[%c0_5, %c0_6, %c0_7], %19 {strides = array<i32>} : memref<1x8x128xf32, #tpu.memory_space<vmem>>, vector<1x8x128xf32>,
    return
  }
  func.func @transform_0(%arg0: i32) -> (i32, i32) {
    %c0_i32 = arith.constant 0 : i32
    %c0_i32_0 = arith.constant 0 : i32
    %c0_i32_1 = arith.constant 0 : i32
    return %c0_i32, %c0_i32_0 : i32, i32
  }
  func.func @transform_1(%arg0: i32) -> (i32, i32) {
    %c0_i32 = arith.constant 0 : i32
    %c0_i32_0 = arith.constant 0 : i32
    return %arg0, %c0_i32 : i32, i32
  }
  func.func @transform_2(%arg0: i32) -> (i32, i32, i32) {
    %c0_i32 = arith.constant 0 : i32
    %c0_i32_0 = arith.constant 0 : i32
    %c0_i32_1 = arith.constant 0 : i32
    return %arg0, %c0_i32, %c0_i32_0 : i32, i32, i32
  }
}

</mosaic_0001>

<bundles_post_ra>
// kernel: tpu_custom_call.1
= control target key start
LH: loop header
LB: loop body
LE: loop exit
PB: predicated region body
PF: predicated region fallthrough
CT: control target
= control target key end

     0   :  { %7 = vsyncpa [#allocation3], 0  ;;  %s257_s0 = inlined_call_operand.hbm [shape: f32[2,256], index: 0, kind: input, shape index: {}]   ;;  %s258_s1 = inlined_call_operand.hbm [shape: f32[8,256], index: 1, kind: input, shape index: {}]   ;;  %s259_s2 = inlined_call_operand.hbm [shape: f32[1,8,128], index: 2, kind: output, shape index: {}]  }
   0x1   :  { %8 = vsyncpa [#allocation6], 0 }
   0x2   :  { %9 = vsyncpa [#allocation4], 0  ;;  %s201_s9 = smov [#allocation2]   ;;  %s202_s11 = smov [#allocation5]  }
   0x3   :  { %s16_s10 = sshll.u32 %s201_s9, 4  ;;  %s26_s12 = sshll.u32 %s202_s11, 4  ;;  %s17_s10 = int_to_ptr.vmem [resolvable:$true] %s16_s10  ;;  %s27_s12 = int_to_ptr.vmem [resolvable:$true] %s26_s12 }
   0x4   :  { %s129_s15 = scalar_lea.hbm %s257_s0, 64 }
   0x5   :  { %p130_p0 = scmp.ne.s32.totalorder %s257_s0, %s129_s15  ;;  %p133_p1 = scmp.lt.u32.totalorder %s129_s15, %s257_s0 }
   0x7   :  { %p135_p2 = pnand %p133_p1, %p130_p0 }
   0x9   :  { %138 = shalt.err (!%p135_p2)
}
   0xa   :  { %s139_s20 = scalar_lea.vmem %s17_s10, 64  ;;  %p144_p4 = scmp.lt.s32.totalorder %s17_s10, %s17_s10 }
   0xb   :  { %p140_p3 = scmp.ne.s32.totalorder %s17_s10, %s139_s20  ;;  %p145_p5 = scmp.lt.s32.totalorder %s139_s20, %s139_s20 }
   0xd   :  { %p146_p6 = por %p145_p5, %p144_p4 }
   0xf   :  { %p147_p7 = pnand %p146_p6, %p140_p3 }
  0x11   :  { %150 = shalt.err (!%p147_p7)
}
  0x12   :  { %19 = dma.hbm_to_vmem [thread:$0]  %s257_s0, 64, %s17_s10, [#allocation3]  }
  0x13   :  { %s151_s25 = scalar_lea.hbm %s258_s1, 256 }
  0x14   :  { %p152_p8 = scmp.ne.s32.totalorder %s258_s1, %s151_s25  ;;  %p155_p9 = scmp.lt.u32.totalorder %s151_s25, %s258_s1 }
  0x16   :  { %p157_p10 = pnand %p155_p9, %p152_p8 }
  0x18   :  { %160 = shalt.err (!%p157_p10)
}
  0x19   :  { %s161_s30 = scalar_lea.vmem %s27_s12, 256  ;;  %p166_p12 = scmp.lt.s32.totalorder %s27_s12, %s27_s12 }
  0x1a   :  { %p162_p11 = scmp.ne.s32.totalorder %s27_s12, %s161_s30  ;;  %p167_p13 = scmp.lt.s32.totalorder %s161_s30, %s161_s30 }
  0x1c   :  { %p168_p0 = por %p167_p13, %p166_p12 }
  0x1e   :  { %p169_p1 = pnand %p168_p0, %p162_p11 }
  0x20   :  { %172 = shalt.err (!%p169_p1)
}
  0x21   :  { %29 = dma.hbm_to_vmem [thread:$0]  %s258_s1, 256, %s27_s12, [#allocation6]  }
  0x22   :  { %195 = dma.done.wait [#allocation3], 64  }
  0x23   :  { %196 = vsyncadd [#allocation3], 4294967232 }
  0x24   :  { %197 = dma.done.wait [#allocation6], 256  }
  0x25   :  { %198 = vsyncadd [#allocation6], 4294967040  ;;  %v36_v0 = vld [vmem:[#allocation5] sm:$0xff]  ;;  %s203_s4 = smov 127   ;;  %s204_s5 = smov 112   ;;  %v37_v1 = vld [vmem:[#allocation5 + $0x8] sm:$0xff]  ;;  %v42_v2 = vlaneseq }
  0x26   :  { %47 = vrot.lane.b32.xlu1 %v36_v0, %s203_s4  ;;  %38 = vrot.lane.b32.xlu0 %v36_v0, %s204_s5  ;;  %v73_v9 = vld [vmem:[#allocation2 + $0x1] ss:$2 sm:$0x3]  ;;  %v56_v10 = vld [vmem:[#allocation2] ss:$2 sm:$0x3] }
  0x27   :  { %v59_v3 = vshrl.u32 %v42_v2, 7  ;;  %v43_v4 = vand.u32 127, %v42_v2  ;;  %s205_s1 = smov [#allocation7]  }
  0x28   :  { %s112_s6 = sshll.u32 %s205_s1, 4  ;;  %s113_s6 = int_to_ptr.vmem [resolvable:$true] %s112_s6 }
  0x29   :  { %v60_v7 = vsub.s32 0, %v59_v3  ;;  %v64_v8 = vsub.s32 1, %v59_v3  ;;  %vm51_vm0 = vcmp.lt.s32.totalorder %v43_v4, 127  ;;  %vm44_vm1 = vcmp.lt.s32.totalorder %v43_v4, 112  ;;  %s173_s9 = scalar_lea.vmem %s113_s6, 128  ;;  %p178_p3 = scmp.lt.s32.totalorder %s113_s6, %s113_s6 }
  0x2a   :  { %49 = vrot.lane.b32.xlu1 %v37_v1, %s203_s4  ;;  %40 = vrot.lane.b32.xlu0 %v37_v1, %s204_s5  ;;  %p174_p2 = scmp.ne.s32.totalorder %s113_s6, %s173_s9  ;;  %p179_p4 = scmp.lt.s32.totalorder %s173_s9, %s173_s9 }
  0x2b   :  { %v78_v11 = vrot.slane %v73_v9, %v60_v7  ;;  %v82_v12 = vrot.slane %v73_v9, %v64_v8  ;;  %v61_v14 = vrot.slane %v56_v10, %v60_v7  ;;  %v65_v15 = vrot.slane %v56_v10, %v64_v8 }
  0x2c   :  { %p180_p5 = por %p179_p4, %p178_p3 }
  0x2e   :  { %p181_p6 = pnand %p180_p5, %p174_p2 }
  0x98   :  { %v48_v5 = vpop.permute.xlu1 %47  ;;  %v39_v6 = vpop.permute.xlu0 %38 }
  0x9c   :  { %v50_v13 = vpop.permute.xlu1 %49  ;;  %v41_v16 = vpop.permute.xlu0 %40 }
  0x9d   :  { %v52_v17 = vsel %vm51_vm0, %v48_v5, %v50_v13  ;;  %v53_v18 = vsel %vm51_vm0, %v50_v13, %v48_v5  ;;  %v45_v19 = vsel %vm44_vm1, %v39_v6, %v41_v16  ;;  %v46_v20 = vsel %vm44_vm1, %v41_v16, %v39_v6 }
  0x9e   :  { %v70_v21 = vsub.f32 %v52_v17, %v36_v0  ;;  %v71_v22 = vsub.f32 %v53_v18, %v37_v1  ;;  %v54_v23 = vsub.f32 %v45_v19, %v36_v0  ;;  %v55_v24 = vsub.f32 %v46_v20, %v37_v1 }
  0xa0   :  { %v85_v25 = vmul.f32 %v78_v11, %v70_v21  ;;  %v86_v26 = vmul.f32 %v82_v12, %v71_v22  ;;  %v68_v27 = vmul.f32 %v61_v14, %v54_v23  ;;  %v69_v28 = vmul.f32 %v65_v15, %v55_v24 }
  0xa2   :  { %v89_v29 = vand.u32 2147483647, %v85_v25  ;;  %v90_v30 = vand.u32 2147483647, %v86_v26  ;;  %v87_v31 = vand.u32 2147483647, %v68_v27 }
  0xa3   :  { %v88_v32 = vand.u32 2147483647, %v69_v28 }
  0xa4   :  { %v91_v33 = vadd.f32 %v89_v29, %v87_v31 }
  0xa5   :  { %v92_v34 = vadd.f32 %v90_v30, %v88_v32 }
  0xa7   :  { %v93_v35 = vadd.f32 %v92_v34, %v91_v33 }
  0xa9   :  { %94 = vadd.xlane.f32.xlu0 %v93_v35 }
 0x136   :  { %v95_v36 = vpop.xlane.xlu0 %94 }
 0x137   :  { %v96_v37 = vrot.slane %v95_v36, 4 }
 0x139   :  { %v97_v38 = vadd.f32 %v96_v37, %v95_v36 }
 0x13b   :  { %v98_v39 = vrot.slane %v97_v38, 2 }
 0x13d   :  { %v99_v40 = vadd.f32 %v98_v39, %v97_v38 }
 0x13f   :  { %v100_v41 = vrot.slane %v99_v40, 1 }
 0x141   :  { %v101_v42 = vadd.f32 %v100_v41, %v99_v40 }
 0x143   :  { %122 = vpush %v101_v42 }
 0x174   :  { %s123_s7 = spop %122 }
 0x175   :  { %s103_s8 = smul.f32 0.00024414063, %s123_s7 }
 0x177   :  { %v104_v43 = vstv %s103_s8 }
 0x178   :  { %105 = vst [vmem:[#allocation7] sm:$0xff] %v104_v43 }
 0x179   :  { %184 = shalt.err (!%p181_p6)
}
 0x17a   :  { %s185_s12 = scalar_lea.hbm %s259_s2, 128 }
 0x17b   :  { %p186_p7 = scmp.ne.s32.totalorder %s259_s2, %s185_s12  ;;  %p189_p8 = scmp.lt.u32.totalorder %s185_s12, %s259_s2 }
 0x17d   :  { %p191_p9 = pnand %p189_p8, %p186_p7 }
 0x17f   :  { %194 = shalt.err (!%p191_p9)
}
 0x180   :  { %115 = dma.vmem_to_hbm [thread:$0]  %s113_s6, 128, %s259_s2, [#allocation4]  }
 0x181   :  { %199 = dma.done.wait [#allocation4], 128  }
 0x182   :  { %200 = vsyncadd [#allocation4], 4294967168 }
 0x183   :  { %119 = vsyncpa [#allocation3], 1 }
 0x184   :  { %120 = vsyncpa [#allocation6], 1 }
 0x185   :  { %121 = vsyncpa [#allocation4], 1 }

</bundles_post_ra>
